<compile_context>
chip_gen: v7x
topology: tpu7x:2x2x1
jax: 0.10.0
libtpu: 0.0.40
codegen_flags: <defaults>
</compile_context>

<pallas_src>
import math
import functools

import jax
import jax.numpy as jnp
from jax.experimental import pallas as pl
from jax.experimental.pallas import tpu as pltpu


def _lookahead_kernel(x_ref, w_ref, o_ref, carry_ref):
    # x_ref:     (seq_tile, lane_tile)   current sequence tile
    # w_ref:     (context+1, lane_tile)  weight, replicated across batch lanes
    # o_ref:     (seq_tile, lane_tile)   output tile
    # carry_ref: (context, lane_tile)    first `context` rows of the NEXT seq
    #                                    tile (zeros for the final tile).
    s = pl.program_id(1)
    context = carry_ref.shape[0]
    seq_tile = o_ref.shape[0]

    # First grid step along seq == the LAST sequence tile (seq axis is
    # iterated in reverse): the rows beyond the end are the zero padding.
    @pl.when(s == 0)
    def _():
        carry_ref[...] = jnp.zeros_like(carry_ref)

    x = x_ref[...].astype(jnp.float32)                     # (St, L)
    ext = jnp.concatenate([x, carry_ref[...]], axis=0)     # (St + ctx, L)

    acc = jnp.zeros(o_ref.shape, jnp.float32)
    # context is a static Python int -> fully unrolled VPU loop.
    for c in range(context + 1):
        w_row = w_ref[c, :].astype(jnp.float32)[None, :]
        acc = acc + ext[c:c + seq_tile, :] * w_row
    o_ref[...] = acc.astype(o_ref.dtype)

    # Hand the first `context` rows of this tile to the next (earlier) step.
    carry_ref[...] = x[:context, :]


def _choose_tile(n, preferred, align, min_tile=1):
    """Largest divisor of n that is <= preferred, >= min_tile and a multiple
    of `align`; falls back to the full dimension (always a legal block)."""
    if n <= preferred:
        return n
    t = preferred - (preferred % align)
    while t >= align:
        if n % t == 0 and t >= min_tile:
            return t
        t -= align
    return n


@functools.partial(jax.jit, static_argnames=("context", "seq_tile", "lane_tile"))
def lookahead(x, weight, *, context, seq_tile=None, lane_tile=None):
    """x: (seq, batch, feature), weight: (feature, context+1)."""
    seq, batch, feat = x.shape
    assert weight.shape == (feat, context + 1)

    lanes = batch * feat
    if lane_tile is None:
        lane_tile = _choose_tile(lanes, 512, 128)
    if seq_tile is None:
        seq_tile = _choose_tile(seq, 512, 8, min_tile=context)

    assert seq % seq_tile == 0, f"seq={seq} not divisible by seq_tile={seq_tile}"
    assert lanes % lane_tile == 0, (
        f"batch*feature={lanes} not divisible by lane_tile={lane_tile}")
    assert context <= seq_tile, (
        f"context={context} must not exceed seq_tile={seq_tile}")

    n_seq = seq // seq_tile
    n_lane = lanes // lane_tile

    # (seq, batch, feature) -> (seq, batch*feature): free (row-major contiguous).
    x2 = x.reshape(seq, lanes)
    # Replicate weight across batch along lanes: w2[c, b*feat + f] == weight[f, c].
    w2 = jnp.tile(weight.T, (1, batch))

    itemsize = jnp.dtype(x.dtype).itemsize
    cost = pl.CostEstimate(
        flops=2 * (context + 1) * seq * lanes,
        transcendentals=0,
        bytes_accessed=(2 * seq * lanes * itemsize
                        + w2.size * jnp.dtype(w2.dtype).itemsize),
    )

    out2 = pl.pallas_call(
        _lookahead_kernel,
        out_shape=jax.ShapeDtypeStruct((seq, lanes), x.dtype),
        grid_spec=pltpu.PrefetchScalarGridSpec(
            num_scalar_prefetch=0,
            grid=(n_lane, n_seq),
            in_specs=[
                # Seq axis is iterated in reverse so the carry flows backwards
                # from the end of the sequence toward the beginning.
                pl.BlockSpec((seq_tile, lane_tile),
                             lambda j, s: (n_seq - 1 - s, j)),
                pl.BlockSpec((context + 1, lane_tile),
                             lambda j, s: (0, j)),
            ],
            out_specs=pl.BlockSpec((seq_tile, lane_tile),
                                   lambda j, s: (n_seq - 1 - s, j)),
            scratch_shapes=[pltpu.VMEM((context, lane_tile), jnp.float32)],
        ),
        compiler_params=pltpu.CompilerParams(
            dimension_semantics=("parallel", "arbitrary"),
            vmem_limit_bytes=32 * 1024 * 1024,
        ),
        cost_estimate=cost,
    )(x2, w2)

    return out2.reshape(seq, batch, feat)


def lookahead_reference(x, weight, context):
    # Pure-JAX reference mirroring the PyTorch forward.
    seq = x.shape[0]
    x_pad = jnp.pad(x, ((0, context), (0, 0), (0, 0)))
    windows = jnp.stack([x_pad[i:i + context + 1] for i in range(seq)])  # (S, C+1, B, F)
    windows = jnp.transpose(windows, (0, 2, 3, 1))                       # (S, B, F, C+1)
    return jnp.sum(windows * weight[None, None, :, :], axis=3)           # (S, B, F)


if __name__ == "__main__":
    key = jax.random.PRNGKey(0)
    kx, kw, kx2, kw2 = jax.random.split(key, 4)

    # --- main small config (matches the module's expected shapes) ---
    seq, batch, num_features, context = 8, 2, 256, 3
    x = jax.random.normal(kx, (seq, batch, num_features), dtype=jnp.float32)
    stdv = 1.0 / math.sqrt(context + 1)   # PyTorch init: uniform(-stdv, stdv)
    weight = jax.random.uniform(kw, (num_features, context + 1),
                                minval=-stdv, maxval=stdv, dtype=jnp.float32)

    out = jax.block_until_ready(lookahead(x, weight, context=context))
    ref = lookahead_reference(x, weight, context)
    assert out.shape == (seq, batch, num_features)
    assert jnp.allclose(out, ref, atol=1e-5, rtol=1e-5), "mismatch vs reference"

    # --- second small config forcing multiple seq tiles (exercises the
    #     cross-tile carry that replaces the zero padding) ---
    seq2, batch2, feat2, ctx2 = 32, 2, 128, 3
    x_b = jax.random.normal(kx2, (seq2, batch2, feat2), dtype=jnp.float32)
    w_b = jax.random.uniform(kw2, (feat2, ctx2 + 1),
                             minval=-stdv, maxval=stdv, dtype=jnp.float32)
    out_b = jax.block_until_ready(
        lookahead(x_b, w_b, context=ctx2, seq_tile=16, lane_tile=256))
    ref_b = lookahead_reference(x_b, w_b, ctx2)
    assert jnp.allclose(out_b, ref_b, atol=1e-5, rtol=1e-5), "mismatch (tiled seq)"

    print("KERNEL_OK")
</pallas_src>

<mosaic_0001>
module attributes {stable_mosaic.version = 11 : i64} {
  func.func @_lookahead_kernel(%arg0: i32, %arg1: i32, %arg2: memref<8x512xf32, #tpu.memory_space<vmem>>, %arg3: memref<4x512xf32, #tpu.memory_space<vmem>>, %arg4: memref<8x512xf32, #tpu.memory_space<vmem>>, %arg5: memref<3x512xf32, #tpu.memory_space<vmem>>) attributes {dimension_semantics = [#tpu.dimension_semantics<parallel>, #tpu.dimension_semantics<arbitrary>], iteration_bounds = array<i64: 1, 1>, scalar_prefetch = 0 : i64, scratch_operands = 1 : i64, tpu.core_type = #tpu.core_type<tc>, window_params = [{transform_indices = @transform_0, window_bounds = array<i64: 8, 512>}, {transform_indices = @transform_1, window_bounds = array<i64: 4, 512>}, {transform_indices = @transform_2, window_bounds = array<i64: 8, 512>}]} {
    %c0_i32 = arith.constant 0 : i32
    %0 = arith.cmpi eq, %arg1, %c0_i32 : i32
    %1 = arith.extui %0 : i1 to i32
    %c0_i32_0 = arith.constant 0 : i32
    %2 = arith.cmpi ne, %1, %c0_i32_0 : i32
    scf.if %2 {
      %cst_13 = arith.constant 0.000000e+00 : f32
      %38 = vector.broadcast %cst_13 : f32 to vector<3x512xf32>
      %c0_14 = arith.constant 0 : index
      %c0_15 = arith.constant 0 : index
      %39 = vector.load %arg5[%c0_14, %c0_15] : memref<3x512xf32, #tpu.memory_space<vmem>>, vector<3x512xf32>
      tpu.vector_store %arg5[%c0_14, %c0_15], %38 {strides = array<i32>} : memref<3x512xf32, #tpu.memory_space<vmem>>, vector<3x512xf32>,
    } else {
    }
    %c0 = arith.constant 0 : index
    %c0_1 = arith.constant 0 : index
    %3 = vector.load %arg2[%c0, %c0_1] : memref<8x512xf32, #tpu.memory_space<vmem>>, vector<8x512xf32>
    %c0_2 = arith.constant 0 : index
    %c0_3 = arith.constant 0 : index
    %4 = vector.load %arg5[%c0_2, %c0_3] : memref<3x512xf32, #tpu.memory_space<vmem>>, vector<3x512xf32>
    %5 = tpu.concatenate %3, %4 in 0 : vector<8x512xf32>, vector<3x512xf32> -> vector<11x512xf32>
    %cst = arith.constant 0.000000e+00 : f32
    %6 = vector.broadcast %cst : f32 to vector<8x512xf32>
    %c0_4 = arith.constant 0 : index
    %c0_5 = arith.constant 0 : index
    %7 = vector.load %arg3[%c0_4, %c0_5] : memref<4x512xf32, #tpu.memory_space<vmem>>, vector<1x512xf32>
    %8 = vector.shape_cast %7 : vector<1x512xf32> to vector<512xf32>
    %9 = vector.shape_cast %8 : vector<512xf32> to vector<1x512xf32>
    %10 = vector.extract_strided_slice %5 {offsets = [0, 0], sizes = [8, 512], strides = [1, 1]} : vector<11x512xf32> to vector<8x512xf32>
    %11 = vector.broadcast %9 : vector<1x512xf32> to vector<8x512xf32>
    %12 = arith.mulf %10, %11 : vector<8x512xf32>
    %13 = arith.addf %6, %12 : vector<8x512xf32>
    %c1 = arith.constant 1 : index
    %c0_6 = arith.constant 0 : index
    %14 = vector.load %arg3[%c1, %c0_6] : memref<4x512xf32, #tpu.memory_space<vmem>>, vector<1x512xf32>
    %15 = vector.shape_cast %14 : vector<1x512xf32> to vector<512xf32>
    %16 = vector.shape_cast %15 : vector<512xf32> to vector<1x512xf32>
    %17 = vector.extract_strided_slice %5 {offsets = [1, 0], sizes = [8, 512], strides = [1, 1]} : vector<11x512xf32> to vector<8x512xf32>
    %18 = vector.broadcast %16 : vector<1x512xf32> to vector<8x512xf32>
    %19 = arith.mulf %17, %18 : vector<8x512xf32>
    %20 = arith.addf %13, %19 : vector<8x512xf32>
    %c2 = arith.constant 2 : index
    %c0_7 = arith.constant 0 : index
    %21 = vector.load %arg3[%c2, %c0_7] : memref<4x512xf32, #tpu.memory_space<vmem>>, vector<1x512xf32>
    %22 = vector.shape_cast %21 : vector<1x512xf32> to vector<512xf32>
    %23 = vector.shape_cast %22 : vector<512xf32> to vector<1x512xf32>
    %24 = vector.extract_strided_slice %5 {offsets = [2, 0], sizes = [8, 512], strides = [1, 1]} : vector<11x512xf32> to vector<8x512xf32>
    %25 = vector.broadcast %23 : vector<1x512xf32> to vector<8x512xf32>
    %26 = arith.mulf %24, %25 : vector<8x512xf32>
    %27 = arith.addf %20, %26 : vector<8x512xf32>
    %c3 = arith.constant 3 : index
    %c0_8 = arith.constant 0 : index
    %28 = vector.load %arg3[%c3, %c0_8] : memref<4x512xf32, #tpu.memory_space<vmem>>, vector<1x512xf32>
    %29 = vector.shape_cast %28 : vector<1x512xf32> to vector<512xf32>
    %30 = vector.shape_cast %29 : vector<512xf32> to vector<1x512xf32>
    %31 = vector.extract_strided_slice %5 {offsets = [3, 0], sizes = [8, 512], strides = [1, 1]} : vector<11x512xf32> to vector<8x512xf32>
    %32 = vector.broadcast %30 : vector<1x512xf32> to vector<8x512xf32>
    %33 = arith.mulf %31, %32 : vector<8x512xf32>
    %34 = arith.addf %27, %33 : vector<8x512xf32>
    %c0_9 = arith.constant 0 : index
    %c0_10 = arith.constant 0 : index
    %35 = vector.load %arg4[%c0_9, %c0_10] : memref<8x512xf32, #tpu.memory_space<vmem>>, vector<8x512xf32>
    tpu.vector_store %arg4[%c0_9, %c0_10], %34 {strides = array<i32>} : memref<8x512xf32, #tpu.memory_space<vmem>>, vector<8x512xf32>,
    %36 = vector.extract_strided_slice %3 {offsets = [0, 0], sizes = [3, 512], strides = [1, 1]} : vector<8x512xf32> to vector<3x512xf32>
    %c0_11 = arith.constant 0 : index
    %c0_12 = arith.constant 0 : index
    %37 = vector.load %arg5[%c0_11, %c0_12] : memref<3x512xf32, #tpu.memory_space<vmem>>, vector<3x512xf32>
    tpu.vector_store %arg5[%c0_11, %c0_12], %36 {strides = array<i32>} : memref<3x512xf32, #tpu.memory_space<vmem>>, vector<3x512xf32>,
    return
  }
  func.func @transform_0(%arg0: i32, %arg1: i32) -> (i32, i32) {
    %c0_i32 = arith.constant 0 : i32
    %0 = arith.subi %c0_i32, %arg1 : i32
    %c0_i32_0 = arith.constant 0 : i32
    return %0, %arg0 : i32, i32
  }
  func.func @transform_1(%arg0: i32, %arg1: i32) -> (i32, i32) {
    %c0_i32 = arith.constant 0 : i32
    %c0_i32_0 = arith.constant 0 : i32
    return %c0_i32, %arg0 : i32, i32
  }
  func.func @transform_2(%arg0: i32, %arg1: i32) -> (i32, i32) {
    %c0_i32 = arith.constant 0 : i32
    %0 = arith.subi %c0_i32, %arg1 : i32
    %c0_i32_0 = arith.constant 0 : i32
    return %0, %arg0 : i32, i32
  }
}

</mosaic_0001>

<bundles_post_ra>
// kernel: lookahead.1
= control target key start
LH: loop header
LB: loop body
LE: loop exit
PB: predicated region body
PF: predicated region fallthrough
CT: control target
= control target key end

     0   :  { %v64_v0 = vlaneseq  ;;  %v325_v1 = vmov 0.0   ;;  %vm131_vm0 = vcmask 1046528   ;;  %vm191_vm1 = vcmask 1045504   ;;  %s433_s0 = inlined_call_operand.vmem [shape: f32[8,512], index: 0, kind: input, shape index: {}]   ;;  %s434_s1 = inlined_call_operand.vmem [shape: f32[4,512], index: 1, kind: input, shape index: {}]   ;;  %s435_s2 = inlined_call_operand.vmem [shape: f32[8,512], index: 2, kind: output, shape index: {}]  }
   0x1   :  { %48 = vst [vmem:[#allocation2] sm:$0x77] %v325_v1  ;;  %49 = vst [vmem:[#allocation2 + $0x8] sm:$0x77] %v325_v1  ;;  %v50_v3 = vld [vmem:[%s433_s0] sm:$0xff]  ;;  %vm251_vm2 = vcmask 1044480  }
   0x2   :  { %v344_v2 = vld [vmem:[%s434_s1] ss:$4 sm:$0xf]  ;;  %v65_v4 = vshrl.u32 %v64_v0, 7  ;;  %v52_v9 = vld [vmem:[%s433_s0 + $0x10] sm:$0xff]  ;;  %v375_v12 = vld [vmem:[%s433_s0 + $0x18] sm:$0xff] }
   0x3   :  { %v352_v5 = vld [vmem:[%s434_s1 + $0x1] ss:$4 sm:$0xf]  ;;  %v357_v6 = vld [vmem:[%s434_s1 + $0x2] ss:$4 sm:$0xf]  ;;  %v281_v16 = vcombine.low %v52_v9, %v375_v12 }
   0x4   :  { %v362_v7 = vld [vmem:[%s434_s1 + $0x3] ss:$4 sm:$0xf]  ;;  %v66_v8 = vsub.s32 0, %v65_v4  ;;  %v74_v10 = vsub.s32 2, %v65_v4  ;;  %v70_v13 = vsub.s32 1, %v65_v4 }
   0x5   :  { %v370_v11 = vld [vmem:[%s433_s0 + $0x8] sm:$0xff]  ;;  %v377_v14 = vsub.s32 3, %v65_v4 }
   0x6   :  { %v280_v15 = vcombine.low %v50_v3, %v370_v11  ;;  %v67_v17 = vrot.slane %v344_v2, %v66_v8  ;;  %v98_v18 = vrot.slane %v352_v5, %v66_v8  ;;  %v158_v19 = vrot.slane %v357_v6, %v66_v8 }
   0x7   :  { %v218_v20 = vrot.slane %v362_v7, %v66_v8  ;;  %v75_v21 = vrot.slane %v344_v2, %v74_v10  ;;  %v106_v22 = vrot.slane %v352_v5, %v74_v10  ;;  %v166_v23 = vrot.slane %v357_v6, %v74_v10 }
   0x8   :  { %v226_v24 = vrot.slane %v362_v7, %v74_v10  ;;  %v54_v25 = vld [vmem:[#allocation2] sm:$0x77]  ;;  %v84_v26 = vmul.f32 %v67_v17, %v50_v3  ;;  %v115_v27 = vmul.f32 %v98_v18, %v50_v3  ;;  %v175_v28 = vmul.f32 %v158_v19, %v50_v3  ;;  %v55_v30 = vld [vmem:[#allocation2 + $0x8] sm:$0x77] }
   0x9   :  { %v235_v29 = vmul.f32 %v218_v20, %v50_v3  ;;  %v119_v31 = vmul.f32 %v98_v18, %v54_v25  ;;  %v179_v32 = vmul.f32 %v158_v19, %v54_v25  ;;  %v239_v33 = vmul.f32 %v218_v20, %v54_v25  ;;  %284 = vst [vmem:[#allocation2] sm:$0x77] %v280_v15 }
   0xa   :  { %v86_v34 = vmul.f32 %v75_v21, %v52_v9  ;;  %285 = vst [vmem:[#allocation2 + $0x8] sm:$0x77] %v281_v16  ;;  %v132_v35 = vrot.slane %v115_v27, 1  ;;  %v192_v36 = vrot.slane %v175_v28, 2  ;;  %v117_v38 = vmul.f32 %v106_v22, %v52_v9 }
   0xb   :  { %v252_v37 = vrot.slane %v235_v29, 3  ;;  %v133_v39 = vrot.slane %v119_v31, 1  ;;  %v193_v40 = vrot.slane %v179_v32, 2  ;;  %v253_v41 = vrot.slane %v239_v33, 3 }
   0xc   :  { %v121_v42 = vmul.f32 %v106_v22, %v55_v30  ;;  %v138_v43 = vrot.slane %v117_v38, 1  ;;  %v177_v44 = vmul.f32 %v166_v23, %v52_v9  ;;  %v181_v45 = vmul.f32 %v166_v23, %v55_v30 }
   0xd   :  { %v237_v46 = vmul.f32 %v226_v24, %v52_v9  ;;  %v134_v47 = vsel %vm131_vm0, %v132_v35, %v133_v39  ;;  %v194_v48 = vsel %vm191_vm1, %v192_v36, %v193_v40  ;;  %v254_v49 = vsel %vm251_vm2, %v252_v37, %v253_v41 }
   0xe   :  { %v139_v50 = vrot.slane %v121_v42, 1  ;;  %v148_v51 = vadd.f32 %v134_v47, %v84_v26  ;;  %v198_v52 = vrot.slane %v177_v44, 2  ;;  %v199_v53 = vrot.slane %v181_v45, 2 }
   0xf   :  { %v241_v54 = vmul.f32 %v226_v24, %v55_v30  ;;  %v258_v56 = vrot.slane %v237_v46, 3  ;;  %v58_v57 = vcombine.high %v54_v25, %v54_v25  ;;  %v71_v58 = vrot.slane %v344_v2, %v70_v13 }
  0x10   :  { %v140_v55 = vsel %vm131_vm0, %v138_v43, %v139_v50  ;;  %v208_v59 = vadd.f32 %v194_v48, %v148_v51  ;;  %v200_v61 = vsel %vm191_vm1, %v198_v52, %v199_v53  ;;  %v102_v0 = vrot.slane %v352_v5, %v70_v13 }
  0x11   :  { %v150_v60 = vadd.f32 %v140_v55, %v86_v34  ;;  %v259_v62 = vrot.slane %v241_v54, 3  ;;  %v85_v63 = vmul.f32 %v71_v58, %v370_v11  ;;  %v162_v1 = vrot.slane %v357_v6, %v70_v13 }
  0x12   :  { %v222_v3 = vrot.slane %v362_v7, %v70_v13  ;;  %v268_v4 = vadd.f32 %v254_v49, %v208_v59  ;;  %v59_v10 = vcombine.high %v55_v30, %v55_v30  ;;  %v116_v15 = vmul.f32 %v102_v0, %v370_v11 }
  0x13   :  { %v210_v8 = vadd.f32 %v200_v61, %v150_v60  ;;  %v260_v9 = vsel %vm251_vm2, %v258_v56, %v259_v62  ;;  %v120_v16 = vmul.f32 %v102_v0, %v58_v57  ;;  %v176_v17 = vmul.f32 %v162_v1, %v370_v11 }
  0x14   :  { %v180_v18 = vmul.f32 %v162_v1, %v58_v57  ;;  %272 = vst [vmem:[%s435_s2] sm:$0xff] %v268_v4  ;;  %v236_v20 = vmul.f32 %v222_v3, %v370_v11  ;;  %v240_v21 = vmul.f32 %v222_v3, %v58_v57  ;;  %v79_v13 = vrot.slane %v344_v2, %v377_v14 }
  0x15   :  { %v270_v19 = vadd.f32 %v260_v9, %v210_v8  ;;  %v135_v22 = vrot.slane %v116_v15, 1  ;;  %v136_v23 = vrot.slane %v120_v16, 1  ;;  %v195_v24 = vrot.slane %v176_v17, 2 }
  0x16   :  { %v196_v25 = vrot.slane %v180_v18, 2  ;;  %v255_v26 = vrot.slane %v236_v20, 3  ;;  %v256_v27 = vrot.slane %v240_v21, 3  ;;  %v110_v28 = vrot.slane %v352_v5, %v377_v14 }
  0x17   :  { %274 = vst [vmem:[%s435_s2 + $0x10] sm:$0xff] %v270_v19  ;;  %v137_v29 = vsel %vm131_vm0, %v135_v22, %v136_v23  ;;  %v87_v11 = vmul.f32 %v79_v13, %v375_v12  ;;  %v170_v2 = vrot.slane %v357_v6, %v377_v14  ;;  %v230_v30 = vrot.slane %v362_v7, %v377_v14 }
  0x18   :  { %v149_v31 = vadd.f32 %v137_v29, %v85_v63  ;;  %v197_v32 = vsel %vm191_vm1, %v195_v24, %v196_v25  ;;  %v118_v33 = vmul.f32 %v110_v28, %v375_v12  ;;  %v122_v34 = vmul.f32 %v110_v28, %v59_v10 }
  0x19   :  { %v178_v35 = vmul.f32 %v170_v2, %v375_v12  ;;  %v182_v36 = vmul.f32 %v170_v2, %v59_v10  ;;  %v238_v5 = vmul.f32 %v230_v30, %v375_v12  ;;  %v242_v37 = vmul.f32 %v230_v30, %v59_v10 }
  0x1a   :  { %v209_v38 = vadd.f32 %v197_v32, %v149_v31  ;;  %v141_v39 = vrot.slane %v118_v33, 1  ;;  %v142_v40 = vrot.slane %v122_v34, 1  ;;  %v257_v6 = vsel %vm251_vm2, %v255_v26, %v256_v27 }
  0x1b   :  { %v201_v41 = vrot.slane %v178_v35, 2  ;;  %v202_v42 = vrot.slane %v182_v36, 2  ;;  %v261_v43 = vrot.slane %v238_v5, 3  ;;  %v262_v44 = vrot.slane %v242_v37, 3 }
  0x1c   :  { %v269_v7 = vadd.f32 %v257_v6, %v209_v38  ;;  %v143_v14 = vsel %vm131_vm0, %v141_v39, %v142_v40 }
  0x1d   :  { %v151_v45 = vadd.f32 %v143_v14, %v87_v11  ;;  %v203_v12 = vsel %vm191_vm1, %v201_v41, %v202_v42  ;;  %v263_v47 = vsel %vm251_vm2, %v261_v43, %v262_v44 }
  0x1e   :  { %273 = vst [vmem:[%s435_s2 + $0x8] sm:$0xff] %v269_v7 }
  0x1f   :  { %v211_v46 = vadd.f32 %v203_v12, %v151_v45 }
  0x21   :  { %v271_v48 = vadd.f32 %v263_v47, %v211_v46 }
  0x23   :  { %275 = vst [vmem:[%s435_s2 + $0x18] sm:$0xff] %v271_v48 }

</bundles_post_ra>
